<compile_context>
chip_gen: v6e
topology: v6e:2x2x1
jax: 0.10.0
libtpu: 0.0.40
codegen_flags: <defaults>
</compile_context>

<pallas_src>
import functools

import numpy as np
import jax
import jax.numpy as jnp
from jax.experimental import pallas as pl
from jax.experimental.pallas import tpu as pltpu  # noqa: F401  (TPU backend)


# ----------------------------------------------------------------------------
# Schedule construction (pure numpy, mirrors the PyTorch __init__ exactly).
# ----------------------------------------------------------------------------
def clip_noise_schedule(alphas2, clip_value=0.001):
    alphas2 = np.concatenate([np.ones(1), alphas2], axis=0)
    alphas_step = alphas2[1:] / alphas2[:-1]
    alphas_step = np.clip(alphas_step, a_min=clip_value, a_max=1.0)
    alphas2 = np.cumprod(alphas_step, axis=0)
    return alphas2


def polynomial_schedule(timesteps: int, s=0.0001, power=3.0):
    steps = timesteps + 1
    x = np.linspace(0, steps, steps)
    alphas2 = (1 - np.power(x / steps, power)) ** 2
    alphas2 = clip_noise_schedule(alphas2, clip_value=0.001)
    precision = 1 - 2 * s
    alphas2 = precision * alphas2 + s
    return alphas2


def build_gamma(noise_schedule: str, timesteps: int, precision: float) -> np.ndarray:
    """Returns gamma as a (timesteps+1,) float32 numpy array."""
    assert 'polynomial' in noise_schedule
    splits = noise_schedule.split('_')
    assert len(splits) == 2
    power = float(splits[1])
    alphas2 = polynomial_schedule(timesteps, s=precision, power=power)
    sigmas2 = 1 - alphas2
    log_alphas2 = np.log(alphas2)
    log_sigmas2 = np.log(sigmas2)
    log_alphas2_to_sigmas2 = log_alphas2 - log_sigmas2
    gamma = (-log_alphas2_to_sigmas2).astype(np.float32)  # (timesteps+1,)
    return gamma


# ----------------------------------------------------------------------------
# Pallas kernel: rounded-index lookup of gamma, lane-dense output.
# ----------------------------------------------------------------------------
def _gamma_lookup_kernel(t_ref, gamma_ref, out_ref, *, timesteps: int):
    # t_ref:     (1, B)     f32 in VMEM  (batch on the lane axis)
    # gamma_ref: (T+1, 1)   f32 in VMEM  (schedule index on the sublane axis)
    # out_ref:   (1, B)     f32 in VMEM
    t = t_ref[...]                                     # (1, B)
    gamma = gamma_ref[...]                             # (T1, 1)
    t1 = gamma.shape[0]
    b = t.shape[1]

    # t_int = round(t * timesteps)   (round-half-to-even, same as torch.round)
    idx = jnp.round(t * jnp.float32(timesteps)).astype(jnp.int32)   # (1, B)
    idx = jnp.clip(idx, 0, timesteps)                                # stay in-table

    # Gather gamma[idx] via select + sublane reduce -> lane-dense (1, B) row.
    rows = jax.lax.broadcasted_iota(jnp.int32, (t1, b), 0)           # (T1, B)
    sel = jnp.where(rows == idx, gamma, jnp.float32(0.0))            # (T1, B)
    out_ref[...] = jnp.sum(sel, axis=0, keepdims=True)               # (1, B)

    # TODO(synk): for large T (1000+ diffusion steps) and large B, switch to an
    # SMEM table (PrefetchScalarGridSpec) + per-row scalar reads, or add a
    # parallel batch grid so the (T+1, B) intermediate stays within VMEM.


def make_predefined_noise_schedule(noise_schedule: str, timesteps: int,
                                   precision: float):
    """Builds gamma once (device-resident, (T+1, 1)) and returns forward(t)."""
    gamma_np = build_gamma(noise_schedule, timesteps, precision)       # (T1,)
    t1 = gamma_np.shape[0]
    gamma_col = jnp.asarray(gamma_np.reshape(t1, 1), dtype=jnp.float32)  # hoisted

    kernel = functools.partial(_gamma_lookup_kernel, timesteps=int(timesteps))

    @jax.jit
    def forward(t: jax.Array) -> jax.Array:
        """t: (B, 1) float32 -> (B, 1) float32."""
        b = t.shape[0]
        t_row = t.reshape(1, b).astype(jnp.float32)     # lane-dense layout
        out_row = pl.pallas_call(
            kernel,
            out_shape=jax.ShapeDtypeStruct((1, b), jnp.float32),
            in_specs=[
                pl.BlockSpec((1, b), lambda: (0, 0)),    # full-array block
                pl.BlockSpec((t1, 1), lambda: (0, 0)),   # full-array block
            ],
            out_specs=pl.BlockSpec((1, b), lambda: (0, 0)),
        )(t_row, gamma_col)
        return out_row.reshape(b, 1)

    return forward, gamma_np


# ----------------------------------------------------------------------------
# Demo / correctness check.
# ----------------------------------------------------------------------------
if __name__ == "__main__":
    noise_schedule = "polynomial_2"
    timesteps = 16
    precision = 1e-4
    batch = 8

    forward, gamma_np = make_predefined_noise_schedule(
        noise_schedule, timesteps, precision)           # gamma_np: (17,)

    # Deterministic inputs: t in [0, 1], shape (batch, 1).
    key = jax.random.PRNGKey(0)
    t = jax.random.uniform(key, (batch, 1), dtype=jnp.float32)

    out = forward(t)
    out = jax.block_until_ready(out)

    # Pure numpy reference of the PyTorch forward (computed in float32).
    t_np = np.asarray(t, dtype=np.float32)
    t_int = np.clip(np.round(t_np * np.float32(timesteps)).astype(np.int64),
                    0, timesteps)
    ref = gamma_np[t_int.squeeze(-1)].reshape(batch, 1)

    assert out.shape == (batch, 1), out.shape
    assert out.dtype == jnp.float32, out.dtype
    np.testing.assert_allclose(np.asarray(out), ref, rtol=1e-6, atol=1e-6)

    print("KERNEL_OK")
</pallas_src>

<mosaic_0001>
module attributes {stable_mosaic.version = 11 : i64} {
  func.func @_gamma_lookup_kernel(%arg0: memref<1x8xf32, #tpu.memory_space<vmem>>, %arg1: memref<17x1xf32, #tpu.memory_space<vmem>>, %arg2: memref<1x8xf32, #tpu.memory_space<vmem>>) attributes {dimension_semantics = [], scalar_prefetch = 0 : i64, scratch_operands = 0 : i64, tpu.core_type = #tpu.core_type<tc>} {
    %c0 = arith.constant 0 : index
    %c0_0 = arith.constant 0 : index
    %0 = vector.load %arg0[%c0, %c0_0] : memref<1x8xf32, #tpu.memory_space<vmem>>, vector<1x8xf32>
    %c0_1 = arith.constant 0 : index
    %c0_2 = arith.constant 0 : index
    %1 = vector.load %arg1[%c0_1, %c0_2] : memref<17x1xf32, #tpu.memory_space<vmem>>, vector<17x1xf32>
    %cst = arith.constant 1.600000e+01 : f32
    %2 = vector.broadcast %cst : f32 to vector<1x8xf32>
    %3 = arith.mulf %0, %2 : vector<1x8xf32>
    %4 = math.roundeven %3 : vector<1x8xf32>
    %5 = arith.fptosi %4 : vector<1x8xf32> to vector<1x8xi32>
    %c0_i32 = arith.constant 0 : i32
    %c16_i32 = arith.constant 16 : i32
    %6 = vector.broadcast %c0_i32 : i32 to vector<1x8xi32>
    %7 = arith.maxsi %6, %5 : vector<1x8xi32>
    %8 = vector.broadcast %c16_i32 : i32 to vector<1x8xi32>
    %9 = arith.minsi %8, %7 : vector<1x8xi32>
    %10 = tpu.iota {dimensions = array<i32: 0>} : vector<17x8xi32>
    %11 = vector.broadcast %9 : vector<1x8xi32> to vector<17x8xi32>
    %12 = arith.cmpi eq, %10, %11 : vector<17x8xi32>
    %cst_3 = arith.constant 0.000000e+00 : f32
    %13 = vector.shape_cast %1 : vector<17x1xf32> to vector<17x1xf32>
    %14 = vector.broadcast %13 : vector<17x1xf32> to vector<17x8xf32>
    %15 = vector.broadcast %cst_3 : f32 to vector<17x8xf32>
    %16 = arith.select %12, %14, %15 : vector<17x8xi1>, vector<17x8xf32>
    %cst_4 = arith.constant dense<0.000000e+00> : vector<8xf32>
    %17 = vector.multi_reduction <add>, %16, %cst_4 [0] : vector<17x8xf32> to vector<8xf32>
    %18 = vector.shape_cast %17 : vector<8xf32> to vector<1x8xf32>
    %c0_5 = arith.constant 0 : index
    %c0_6 = arith.constant 0 : index
    %19 = vector.load %arg2[%c0_5, %c0_6] : memref<1x8xf32, #tpu.memory_space<vmem>>, vector<1x8xf32>
    tpu.vector_store %arg2[%c0_5, %c0_6], %18 {strides = array<i32>} : memref<1x8xf32, #tpu.memory_space<vmem>>, vector<1x8xf32>,
    return
  }
}

</mosaic_0001>

<bundles_post_ra>
// kernel: forward.1
= control target key start
LH: loop header
LB: loop body
LE: loop exit
PB: predicated region body
PF: predicated region fallthrough
CT: control target
= control target key end

     0   :  { %7 = vsyncpa [#allocation3], 0  ;;  %s179_s0 = inlined_call_operand.vmem [shape: f32[1,8], index: 0, kind: input, shape index: {}]   ;;  %s180_s1 = inlined_call_operand.hbm [shape: f32[17,1], index: 1, kind: input, shape index: {}]   ;;  %s181_s2 = inlined_call_operand.hbm [shape: f32[1,8], index: 2, kind: output, shape index: {}]  }
   0x1   :  { %8 = vsyncpa [#allocation4], 0  ;;  %s148_s9 = smov [#allocation2]  }
   0x2   :  { %s16_s10 = sshll.u32 %s148_s9, 4  ;;  %s17_s10 = int_to_ptr.vmem [resolvable:$true] %s16_s10 }
   0x3   :  { %s112_s11 = scalar_lea.vmem %s17_s10, 384  ;;  %p117_p1 = scmp.lt.s32.totalorder %s17_s10, %s17_s10 }
   0x4   :  { %p113_p0 = scmp.ne.s32.totalorder %s17_s10, %s112_s11  ;;  %p118_p2 = scmp.lt.s32.totalorder %s112_s11, %s112_s11 }
   0x6   :  { %p119_p3 = por %p118_p2, %p117_p1 }
   0x8   :  { %p120_p4 = pnand %p119_p3, %p113_p0 }
   0xa   :  { %123 = shalt.err (!%p120_p4)
}
   0xb   :  { %s149_s12 = smov 128   ;;  %s150_s13 = smov 8  }
   0xc   :  { %22 = dma.hbm_to_vmem [thread:$0]  %s180_s1, 384, %s17_s10, [#allocation3], %s149_s12, %s149_s12, %s150_s13  }
   0xd   :  { %144 = dma.done.wait [#allocation3], 384  }
   0xe   :  { %145 = vsyncadd [#allocation3], 4294966912  ;;  %v151_v0 = vmov 0   ;;  %v27_v1 = vld [vmem:[#allocation2] sm:$0xff]  ;;  %v29_v2 = vld [vmem:[#allocation2 + $0x10] sm:$0x1]  ;;  %v36_v7 = vlaneseq }
   0xf   :  { %102 = vset.pattern.permute.xlu0 %v151_v0  ;;  %103 = vset.pattern.permute.xlu1 %v151_v0  ;;  %v28_v3 = vld [vmem:[#allocation2 + $0x8] sm:$0xff]  ;;  %v26_v4 = vld [vmem:[%s179_s0] sm:$0x1]  ;;  %vm65_vm5 = vcmask 64512   ;;  %vm69_vm6 = vcmask 57344   ;;  %s152_s0 = smov [#allocation5]  }
  0x10   :  { %49 = vperm.xlu0 %102, %v27_v1   ;;  %59 = vperm.xlu1 %103, %v29_v2   ;;  %v30_v5 = vmul.f32 16.0, %v26_v4  ;;  %v37_v9 = vshrl.u32 %v36_v7, 7  ;;  %s85_s1 = sshll.u32 %s152_s0, 4  ;;  %s86_s1 = int_to_ptr.vmem [resolvable:$true] %s85_s1 }
  0x11   :  { %s124_s18 = scalar_lea.vmem %s86_s1, 16  ;;  %s128_s19 = scalar_lea.vmem %s86_s1, 32 }
  0x12   :  { %v96_v6 = vcvt.f32.s32 %v30_v5  ;;  %v42_v10 = vsub.s32 0, %v37_v9  ;;  %v39_v13 = vadd.s32 16, %v37_v9  ;;  %v38_v14 = vadd.s32 8, %v37_v9  ;;  %p125_p5 = scmp.ne.s32.totalorder %s86_s1, %s124_s18  ;;  %p129_p6 = scmp.lt.s32.totalorder %s86_s1, %s86_s1 }
  0x13   :  { %p130_p7 = scmp.lt.s32.totalorder %s128_s19, %s124_s18 }
  0x14   :  { %54 = vperm.xlu0 %102, %v28_v3   ;;  %vm32_vm0 = vcmp.gt.s32.totalorder %v96_v6, 0 }
  0x15   :  { %v33_v8 = vsel %vm32_vm0, %v96_v6, 0  ;;  %p131_p8 = por %p130_p7, %p129_p6 }
  0x16   :  { %vm34_vm1 = vcmp.lt.s32.totalorder %v33_v8, 16 }
  0x17   :  { %v35_v11 = vsel %vm34_vm1, %v33_v8, 16  ;;  %p132_p9 = pnand %p131_p8, %p125_p5 }
  0x18   :  { %v43_v12 = vrot.slane %v35_v11, %v42_v10 }
  0x1a   :  { %vm44_vm2 = vcmp.eq.s32.totalorder %v37_v9, %v43_v12  ;;  %vm46_vm3 = vcmp.eq.s32.totalorder %v39_v13, %v43_v12  ;;  %vm45_vm4 = vcmp.eq.s32.totalorder %v38_v14, %v43_v12 }
  0x8b   :  { %v50_v15 = vpop.permute.xlu0 %49  ;;  %v60_v16 = vpop.permute.xlu1 %59 }
  0x8c   :  { %v62_v17 = vsel %vm44_vm2, %v50_v15, 0.0  ;;  %v64_v18 = vsel %vm46_vm3, %v60_v16, 0.0 }
  0x8d   :  { %v66_v21 = vsel %vm65_vm5, %v62_v17, 0.0  ;;  %v70_v23 = vsel %vm69_vm6, %v64_v18, 0.0 }
  0x8f   :  { %v55_v19 = vpop.permute.xlu0 %54 }
  0x90   :  { %v63_v20 = vsel %vm45_vm4, %v55_v19, 0.0 }
  0x91   :  { %v67_v22 = vsel %vm65_vm5, %v63_v20, 0.0 }
  0x92   :  { %v68_v24 = vadd.f32 %v67_v22, %v66_v21 }
  0x94   :  { %v71_v25 = vadd.f32 %v70_v23, %v68_v24 }
  0x96   :  { %v72_v26 = vrot.slane %v71_v25, 4 }
  0x98   :  { %v73_v27 = vadd.f32 %v72_v26, %v71_v25 }
  0x9a   :  { %v74_v28 = vrot.slane %v73_v27, 2 }
  0x9c   :  { %v75_v29 = vadd.f32 %v74_v28, %v73_v27 }
  0x9e   :  { %v76_v30 = vrot.slane %v75_v29, 1 }
  0xa0   :  { %v77_v31 = vadd.f32 %v76_v30, %v75_v29 }
  0xa2   :  { %78 = vst.msk [vmem:[#allocation5] sm:$0x1] %vm69_vm6, %v77_v31 }
  0xa3   :  { %135 = shalt.err (!%p132_p9)
}
  0xa4   :  { %88 = dma.vmem_to_hbm [thread:$0]  %s86_s1, 16, %s181_s2, [#allocation4]  }
  0xa5   :  { %146 = dma.done.wait [#allocation4], 16  }
  0xa6   :  { %147 = vsyncadd [#allocation4], 4294967280 }
  0xa7   :  { %92 = vsyncpa [#allocation3], 1 }
  0xa8   :  { %93 = vsyncpa [#allocation4], 1 }

</bundles_post_ra>
